<compile_context>
chip_gen: v7x
topology: tpu7x:2x2x1
jax: 0.10.0
libtpu: 0.0.40
codegen_flags: <defaults>
</compile_context>

<pallas_src>
import jax
import jax.numpy as jnp
from jax.experimental import pallas as pl
from jax.experimental.pallas import tpu as pltpu

_MIB = 1024 * 1024
_INV_SQRT2 = 0.7071067811865476  # 1/sqrt(2), hoisted constant

# Capability memo: does this jax/Mosaic build accept pipeline_mode=pl.Buffered(1)
# on a top-level pallas_call BlockSpec?  Probed once on the first call.
_SINGLE_BUFFER_OK = None


def _gelu_exact_f32(x):
    # torch.nn.GELU() default: 0.5 * x * (1 + erf(x / sqrt(2)))  (exact, not tanh)
    return 0.5 * x * (1.0 + jax.lax.erf(x * _INV_SQRT2))


def _round_up(a, b):
    return ((a + b - 1) // b) * b


def _vmem_capacity_bytes():
    """Physical VMEM per TensorCore (v5e/v6e: 128 MiB, v7x: 64 MiB per TC)."""
    try:
        info = pltpu.get_tpu_info()
        for attr in ("vmem_capacity_bytes", "vmem_bytes", "vmem_size_bytes"):
            v = getattr(info, attr, None)
            if v:
                return int(v)
    except Exception:
        pass
    return 64 * _MIB  # conservative fallback (v7x-sized)


def _default_stream_tm():
    """Row tile for the weight-streaming path, sized so the per-k-step
    arithmetic intensity on streamed weight bytes (2*tm/csize FLOP/byte for
    bf16) clears the HBM ridge of the local TPU generation."""
    try:
        kind = jax.devices()[0].device_kind.lower()
    except Exception:
        kind = ""
    if "v7" in kind or "tpu7" in kind:
        return 448   # ridge ~ 996 TF/s / 3.2 TB/s ~ 310 FLOP/byte (per TC)
    if "v6" in kind:
        return 768   # ridge ~ 918 TF/s / 1.4 TB/s ~ 650 FLOP/byte
    return 256       # v5e ridge ~ 240 FLOP/byte; safe generic default


def _choose_tm(M, tm_target):
    """Pick a row tile (multiple of 8).  Prefer one that divides M exactly so
    the activation tensor never has to be padded (= copied) in the wrapper."""
    M8 = _round_up(M, 8)
    tm_target = max(8, min(_round_up(int(tm_target), 8), M8))
    if M % 8 == 0:
        t = tm_target
        while t >= 8:
            if M % t == 0:
                if 2 * t >= tm_target or t == M:
                    return t, M          # exact tiling, no activation padding
                break                    # only degenerately small divisors exist
            t -= 8
    # Fall back: pad rows up to a multiple of the target tile (padded rows are
    # sliced off by the wrapper, so the result is exact).
    return tm_target, _round_up(M, tm_target)


def _resident_need(tm, D, H, csize, osize):
    """VMEM bytes for the resident-weight plan.  Weights are counted
    double-buffered so the plan still fits if pl.Buffered(1) is unsupported."""
    return (
        2 * tm * D * csize                   # x tile (double-buffered)
        + 2 * tm * D * osize                 # out tile (double-buffered)
        + 2 * D * H * csize                  # w_fc (resident)
        + 2 * H * D * csize                  # w_proj (resident)
        + 2 * 8 * _round_up(H, 128) * 4      # b_fc (f32, sublane/lane padded)
        + 2 * 8 * _round_up(D, 128) * 4      # b_proj
        + 2 * tm * H * 4                     # f32 c_fc result + GELU temp
        + tm * D * 4                         # f32 c_proj result
    )


def _stream_need(tm, th, D, H, csize, osize):
    """VMEM bytes for the hidden-dim streaming plan."""
    return (
        2 * tm * D * csize                   # x tile
        + 2 * tm * D * osize                 # out tile
        + 2 * D * th * csize                 # w_fc slice (double-buffered)
        + 2 * th * D * csize                 # w_proj slice (double-buffered)
        + 2 * 8 * _round_up(th, 128) * 4     # b_fc slice
        + 2 * 8 * _round_up(D, 128) * 4      # b_proj
        + tm * D * 4                         # f32 accumulator scratch
        + 2 * tm * th * 4                    # f32 c_fc result + GELU temp
    )


def _cost_estimate(M, D, H, csize, osize, weight_passes):
    # weight_passes = 1 for resident weights, M_pad//tm when streaming
    return pl.CostEstimate(
        flops=4 * M * D * H,                 # two matmuls, 2*M*D*H each
        transcendentals=M * H,               # one erf per hidden element
        bytes_accessed=int(
            M * D * csize + M * D * osize
            + weight_passes * 2 * D * H * csize
            + (H + D) * 4),
    )


# --------------------------------------------------------------------------
# Kernels
# --------------------------------------------------------------------------

def _mlp_resident_kernel(x_ref, wfc_ref, bfc_ref, wproj_ref, bproj_ref, o_ref):
    """One row tile with both weight matrices VMEM-resident.

    x_ref:     (tm, D)  activation row tile (compute dtype)
    wfc_ref:   (D, H)   c_fc weight (resident, transposed vs PyTorch)
    bfc_ref:   (1, H)   c_fc bias (f32)
    wproj_ref: (H, D)   c_proj weight (resident)
    bproj_ref: (1, D)   c_proj bias (f32)
    o_ref:     (tm, D)  output row tile
    """
    h = jnp.dot(x_ref[...], wfc_ref[...], preferred_element_type=jnp.float32)
    h = _gelu_exact_f32(h + bfc_ref[...])          # exact erf GELU, f32
    out = jnp.dot(h.astype(wproj_ref.dtype), wproj_ref[...],
                  preferred_element_type=jnp.float32)
    # dropout(p=0.0) / eval mode => identity.
    # TODO(synk): training-mode dropout (p > 0) would build a keep-mask with
    # pltpu.prng_seed + pltpu.prng_random_bits here.
    o_ref[...] = (out + bproj_ref[...]).astype(o_ref.dtype)


def _mlp_stream_kernel(x_ref, wfc_ref, bfc_ref, wproj_ref, bproj_ref, o_ref,
                       acc_ref):
    """One (row tile, hidden slice) step of the weight-streaming variant."""
    k = pl.program_id(1)

    h = jnp.dot(x_ref[...], wfc_ref[...], preferred_element_type=jnp.float32)
    h = _gelu_exact_f32(h + bfc_ref[...])
    part = jnp.dot(h.astype(wproj_ref.dtype), wproj_ref[...],
                   preferred_element_type=jnp.float32)

    @pl.when(k == 0)
    def _first():
        # Fold the c_proj bias into the first partial sum: no (tm, D) zero-fill
        # pass and no separate bias add in the finish branch.
        acc_ref[...] = part + bproj_ref[...]

    @pl.when(k > 0)
    def _accumulate():
        acc_ref[...] += part

    @pl.when(k == pl.num_programs(1) - 1)
    def _finish():
        # dropout(p=0.0) / eval mode => identity (see TODO above).
        o_ref[...] = acc_ref[...].astype(o_ref.dtype)


# --------------------------------------------------------------------------
# pallas_call builders
# --------------------------------------------------------------------------

def _call_resident(x2, w_fc, b_fc, w_proj, b_proj, *, M_pad, D, H, tm,
                   out_dtype, vmem_limit, cost, single_buffer):
    def const_spec(shape):
        # Constant-index inputs are DMA'd exactly once for the whole grid;
        # with pl.Buffered(1) they also get only one VMEM buffer.
        if single_buffer:
            return pl.BlockSpec(shape, lambda i: (0, 0),
                                pipeline_mode=pl.Buffered(1))
        return pl.BlockSpec(shape, lambda i: (0, 0))

    return pl.pallas_call(
        _mlp_resident_kernel,
        out_shape=jax.ShapeDtypeStruct((M_pad, D), out_dtype),
        grid_spec=pltpu.PrefetchScalarGridSpec(
            num_scalar_prefetch=0,
            grid=(M_pad // tm,),
            in_specs=[
                pl.BlockSpec((tm, D), lambda i: (i, 0)),   # x row tile
                const_spec((D, H)),                        # w_fc, resident
                const_spec((1, H)),                        # b_fc
                const_spec((H, D)),                        # w_proj, resident
                const_spec((1, D)),                        # b_proj
            ],
            out_specs=pl.BlockSpec((tm, D), lambda i: (i, 0)),
        ),
        compiler_params=pltpu.CompilerParams(
            dimension_semantics=("parallel",),
            vmem_limit_bytes=vmem_limit,
        ),
        cost_estimate=cost,
    )(x2, w_fc, b_fc, w_proj, b_proj)


def _call_streaming(x2, w_fc, b_fc, w_proj, b_proj, *, M_pad, D, H_pad, tm, th,
                    out_dtype, vmem_limit, cost, single_buffer):
    if single_buffer:
        bproj_spec = pl.BlockSpec((1, D), lambda i, k: (0, 0),
                                  pipeline_mode=pl.Buffered(1))
    else:
        bproj_spec = pl.BlockSpec((1, D), lambda i, k: (0, 0))

    return pl.pallas_call(
        _mlp_stream_kernel,
        out_shape=jax.ShapeDtypeStruct((M_pad, D), out_dtype),
        grid_spec=pltpu.PrefetchScalarGridSpec(
            num_scalar_prefetch=0,
            grid=(M_pad // tm, H_pad // th),
            in_specs=[
                pl.BlockSpec((tm, D), lambda i, k: (i, 0)),   # x row tile
                pl.BlockSpec((D, th), lambda i, k: (0, k)),   # w_fc hidden slice
                pl.BlockSpec((1, th), lambda i, k: (0, k)),   # b_fc hidden slice
                pl.BlockSpec((th, D), lambda i, k: (k, 0)),   # w_proj hidden slice
                bproj_spec,                                    # b_proj (constant)
            ],
            out_specs=pl.BlockSpec((tm, D), lambda i, k: (i, 0)),
            scratch_shapes=[pltpu.VMEM((tm, D), jnp.float32)],
        ),
        compiler_params=pltpu.CompilerParams(
            dimension_semantics=("parallel", "arbitrary"),
            vmem_limit_bytes=vmem_limit,
        ),
        cost_estimate=cost,
    )(x2, w_fc, b_fc, w_proj, b_proj)


# --------------------------------------------------------------------------
# Public wrapper
# --------------------------------------------------------------------------

def gpt_mlp(x, w_fc, b_fc, w_proj, b_proj, *, matmul_dtype=jnp.bfloat16,
            tm=None, th=None, force_streaming=False):
    """Fused GPT MLP forward.  x: (B, T, n_embd) -> (B, T, n_embd).

    w_fc: (n_embd, 4*n_embd), w_proj: (4*n_embd, n_embd) -- transposed vs
    torch.nn.Linear.weight; biases are 1-D.

    matmul_dtype: MXU input dtype (default bf16; accumulation is always f32).
                  Pass weights already in this dtype to avoid a per-call cast.
    tm / th:      optional row / hidden-slice tile overrides.
    force_streaming: force the hidden-dim streaming variant (testing / models
                  whose weights exceed VMEM).
    """
    B, T, D = x.shape
    H = w_fc.shape[1]
    M = B * T
    out_dtype = x.dtype

    cdt = jnp.dtype(matmul_dtype) if matmul_dtype is not None else jnp.dtype(x.dtype)
    csize = cdt.itemsize
    osize = jnp.dtype(out_dtype).itemsize

    # 80% of physical per-core VMEM: ~51 MiB on v7x, ~102 MiB on v5e/v6e.
    budget = int(_vmem_capacity_bytes() * 0.8)

    # ---------------- tile plan (pure Python, shapes only) ----------------
    use_resident = (not force_streaming) and (th is None)
    tm_r = tm_s = th_c = H_pad = None
    M_pad = M
    if use_resident:
        fits = False
        for cand in ([tm] if tm is not None else [512, 256, 128]):
            tm_r, M_pad = _choose_tm(M, cand)
            if _resident_need(tm_r, D, H, csize, osize) <= budget:
                fits = True
                break
        use_resident = fits
        if use_resident and M_pad // tm_r < 2 and M >= 256:
            # v7x megacore balance: prefer >= 2 row tiles when there is work.
            t2, mp2 = _choose_tm(M, max(128, tm_r // 2))
            if mp2 // t2 >= 2:
                tm_r, M_pad = t2, mp2

    if not use_resident:
        th_c = min(_round_up(th if th is not None else 512, 128),
                   _round_up(H, 128))
        tm_s, M_pad = _choose_tm(M, tm if tm is not None else _default_stream_tm())
        while (_stream_need(tm_s, th_c, D, H, csize, osize) > budget
               and (tm_s > 128 or th_c > 128)):
            if tm_s > 128:
                tm_s, M_pad = _choose_tm(M, max(128, tm_s // 2))
            else:
                th_c = max(128, th_c // 2)
        H_pad = _round_up(H, th_c)

    if use_resident:
        need = _resident_need(tm_r, D, H, csize, osize)
        weight_passes = 1
    else:
        need = _stream_need(tm_s, th_c, D, H, csize, osize)
        weight_passes = M_pad // tm_s
    # vmem limit derived from the actual tile plan, capped at the HW budget.
    vmem_limit = int(min(budget, max(32 * _MIB, need + 8 * _MIB)))
    cost = _cost_estimate(M, D, H, csize, osize, weight_passes)

    # ---------------- operand prep ----------------
    x2 = x.reshape(M, D)
    if x2.dtype != cdt:
        x2 = x2.astype(cdt)
    w_fc_c = w_fc if w_fc.dtype == cdt else w_fc.astype(cdt)
    w_proj_c = w_proj if w_proj.dtype == cdt else w_proj.astype(cdt)
    bfc2 = b_fc.reshape(1, H).astype(jnp.float32)
    bproj2 = b_proj.reshape(1, D).astype(jnp.float32)

    if M_pad != M:
        # Only hit when no reasonable tm divides M; padded rows are sliced off
        # below, so results are exact.
        x2 = jnp.pad(x2, ((0, M_pad - M), (0, 0)))
    if (not use_resident) and H_pad != H:
        # Exact: gelu(0 + 0) = 0 and the padded rows of w_proj are zero.
        w_fc_c = jnp.pad(w_fc_c, ((0, 0), (0, H_pad - H)))
        bfc2 = jnp.pad(bfc2, ((0, 0), (0, H_pad - H)))
        w_proj_c = jnp.pad(w_proj_c, ((0, H_pad - H), (0, 0)))

    def run(single_buffer):
        if use_resident:
            return _call_resident(x2, w_fc_c, bfc2, w_proj_c, bproj2,
                                  M_pad=M_pad, D=D, H=H, tm=tm_r,
                                  out_dtype=out_dtype, vmem_limit=vmem_limit,
                                  cost=cost, single_buffer=single_buffer)
        return _call_streaming(x2, w_fc_c, bfc2, w_proj_c, bproj2,
                               M_pad=M_pad, D=D, H_pad=H_pad, tm=tm_s, th=th_c,
                               out_dtype=out_dtype, vmem_limit=vmem_limit,
                               cost=cost, single_buffer=single_buffer)

    global _SINGLE_BUFFER_OK
    if _SINGLE_BUFFER_OK is None:
        try:
            out = jax.block_until_ready(run(True))
            _SINGLE_BUFFER_OK = True
        except Exception:
            # This jax/Mosaic build rejects pipeline_mode=pl.Buffered(1); fall
            # back to default double-buffering.  Constant-index weights are
            # still DMA'd only once since their block index never changes.
            _SINGLE_BUFFER_OK = False
            out = run(False)
    else:
        out = run(_SINGLE_BUFFER_OK)

    if M_pad != M:
        out = out[:M]
    return out.reshape(B, T, D)


def gpt_mlp_reference(x, w_fc, b_fc, w_proj, b_proj):
    h = jnp.dot(x, w_fc) + b_fc
    h = _gelu_exact_f32(h)
    return jnp.dot(h, w_proj) + b_proj


if __name__ == "__main__":
    # config: n_embd=32, bias=True, dropout=0.0; batch=2, seq=8
    B, T, n_embd = 2, 8, 32
    hidden = 4 * n_embd

    key = jax.random.PRNGKey(0)
    kx, kwfc, kbfc, kwproj, kbproj = jax.random.split(key, 5)
    x = jax.random.normal(kx, (B, T, n_embd), dtype=jnp.float32)
    w_fc = jax.random.normal(kwfc, (n_embd, hidden), dtype=jnp.float32) * (1.0 / jnp.sqrt(n_embd))
    b_fc = jax.random.normal(kbfc, (hidden,), dtype=jnp.float32) * 0.01
    w_proj = jax.random.normal(kwproj, (hidden, n_embd), dtype=jnp.float32) * (1.0 / jnp.sqrt(hidden))
    b_proj = jax.random.normal(kbproj, (n_embd,), dtype=jnp.float32) * 0.01

    y_ref = gpt_mlp_reference(x, w_fc, b_fc, w_proj, b_proj)

    # 1) f32 MXU path, resident weights: close to the reference.
    y_f32 = jax.block_until_ready(
        gpt_mlp(x, w_fc, b_fc, w_proj, b_proj, matmul_dtype=jnp.float32))
    assert y_f32.shape == (B, T, n_embd)
    assert jnp.allclose(y_f32, y_ref, atol=1e-4, rtol=1e-4), "f32 resident mismatch"

    # 2) Default bf16 MXU path with pre-cast bf16 weights (f32 accumulation).
    y_bf16 = jax.block_until_ready(
        gpt_mlp(x, w_fc.astype(jnp.bfloat16), b_fc,
                w_proj.astype(jnp.bfloat16), b_proj))
    assert y_bf16.shape == (B, T, n_embd)
    assert jnp.allclose(y_bf16, y_ref, atol=1e-1, rtol=1e-1), "bf16 resident mismatch"

    # 3) Forced weight-streaming path (hidden dim tiled into 2 slices), f32.
    n_embd_b = 64
    hidden_b = 4 * n_embd_b
    kb = jax.random.split(jax.random.PRNGKey(1), 5)
    xb = jax.random.normal(kb[0], (B, T, n_embd_b), dtype=jnp.float32)
    w_fc_b = jax.random.normal(kb[1], (n_embd_b, hidden_b), dtype=jnp.float32) * (1.0 / jnp.sqrt(n_embd_b))
    b_fc_b = jax.random.normal(kb[2], (hidden_b,), dtype=jnp.float32) * 0.01
    w_proj_b = jax.random.normal(kb[3], (hidden_b, n_embd_b), dtype=jnp.float32) * (1.0 / jnp.sqrt(hidden_b))
    b_proj_b = jax.random.normal(kb[4], (n_embd_b,), dtype=jnp.float32) * 0.01

    y_ref_b = gpt_mlp_reference(xb, w_fc_b, b_fc_b, w_proj_b, b_proj_b)
    y_stream = jax.block_until_ready(
        gpt_mlp(xb, w_fc_b, b_fc_b, w_proj_b, b_proj_b,
                matmul_dtype=jnp.float32, th=128, force_streaming=True))
    assert y_stream.shape == (B, T, n_embd_b)
    assert jnp.allclose(y_stream, y_ref_b, atol=1e-4, rtol=1e-4), "f32 streaming mismatch"

    print("KERNEL_OK")
</pallas_src>

<mosaic_0001>
module attributes {stable_mosaic.version = 11 : i64} {
  func.func @_mlp_resident_kernel(%arg0: i32, %arg1: memref<16x32xf32, #tpu.memory_space<vmem>>, %arg2: memref<32x128xf32, #tpu.memory_space<vmem>>, %arg3: memref<1x128xf32, #tpu.memory_space<vmem>>, %arg4: memref<128x32xf32, #tpu.memory_space<vmem>>, %arg5: memref<1x32xf32, #tpu.memory_space<vmem>>, %arg6: memref<16x32xf32, #tpu.memory_space<vmem>>) attributes {dimension_semantics = [#tpu.dimension_semantics<parallel>], iteration_bounds = array<i64: 1>, scalar_prefetch = 0 : i64, scratch_operands = 0 : i64, tpu.core_type = #tpu.core_type<tc>, window_params = [{transform_indices = @transform_0, window_bounds = array<i64: 16, 32>}, {pipeline_mode = #tpu.pipeline_mode<synchronous>, transform_indices = @transform_1, window_bounds = array<i64: 32, 128>}, {pipeline_mode = #tpu.pipeline_mode<synchronous>, transform_indices = @transform_2, window_bounds = array<i64: 1, 128>}, {pipeline_mode = #tpu.pipeline_mode<synchronous>, transform_indices = @transform_3, window_bounds = array<i64: 128, 32>}, {pipeline_mode = #tpu.pipeline_mode<synchronous>, transform_indices = @transform_4, window_bounds = array<i64: 1, 32>}, {transform_indices = @transform_5, window_bounds = array<i64: 16, 32>}]} {
    %c0 = arith.constant 0 : index
    %c0_0 = arith.constant 0 : index
    %0 = vector.load %arg1[%c0, %c0_0] : memref<16x32xf32, #tpu.memory_space<vmem>>, vector<16x32xf32>
    %c0_1 = arith.constant 0 : index
    %c0_2 = arith.constant 0 : index
    %1 = vector.load %arg2[%c0_1, %c0_2] : memref<32x128xf32, #tpu.memory_space<vmem>>, vector<32x128xf32>
    %cst = arith.constant dense<0.000000e+00> : vector<16x128xf32>
    %2 = tpu.matmul %0, %1, %cst {dimension_numbers = #tpu.dot_dimension_numbers<[1], [0], [0], [1], [0, 0, 1, 1], [], []>} : vector<16x32xf32>, vector<32x128xf32>, vector<16x128xf32> -> vector<16x128xf32>
    %c0_3 = arith.constant 0 : index
    %c0_4 = arith.constant 0 : index
    %3 = vector.load %arg3[%c0_3, %c0_4] : memref<1x128xf32, #tpu.memory_space<vmem>>, vector<1x128xf32>
    %4 = vector.broadcast %3 : vector<1x128xf32> to vector<16x128xf32>
    %5 = arith.addf %2, %4 : vector<16x128xf32>
    %cst_5 = arith.constant 5.000000e-01 : f32
    %6 = vector.broadcast %cst_5 : f32 to vector<16x128xf32>
    %7 = arith.mulf %6, %5 : vector<16x128xf32>
    %cst_6 = arith.constant 0.707106769 : f32
    %8 = vector.broadcast %cst_6 : f32 to vector<16x128xf32>
    %9 = arith.mulf %5, %8 : vector<16x128xf32>
    %10 = math.erf %9 : vector<16x128xf32>
    %cst_7 = arith.constant 1.000000e+00 : f32
    %11 = vector.broadcast %cst_7 : f32 to vector<16x128xf32>
    %12 = arith.addf %11, %10 : vector<16x128xf32>
    %13 = arith.mulf %7, %12 : vector<16x128xf32>
    %c0_8 = arith.constant 0 : index
    %c0_9 = arith.constant 0 : index
    %14 = vector.load %arg4[%c0_8, %c0_9] : memref<128x32xf32, #tpu.memory_space<vmem>>, vector<128x32xf32>
    %cst_10 = arith.constant dense<0.000000e+00> : vector<16x32xf32>
    %15 = tpu.matmul %13, %14, %cst_10 {dimension_numbers = #tpu.dot_dimension_numbers<[1], [0], [0], [1], [0, 0, 1, 1], [], []>} : vector<16x128xf32>, vector<128x32xf32>, vector<16x32xf32> -> vector<16x32xf32>
    %c0_11 = arith.constant 0 : index
    %c0_12 = arith.constant 0 : index
    %16 = vector.load %arg5[%c0_11, %c0_12] : memref<1x32xf32, #tpu.memory_space<vmem>>, vector<1x32xf32>
    %17 = vector.broadcast %16 : vector<1x32xf32> to vector<16x32xf32>
    %18 = arith.addf %15, %17 : vector<16x32xf32>
    %c0_13 = arith.constant 0 : index
    %c0_14 = arith.constant 0 : index
    %19 = vector.load %arg6[%c0_13, %c0_14] : memref<16x32xf32, #tpu.memory_space<vmem>>, vector<16x32xf32>
    tpu.vector_store %arg6[%c0_13, %c0_14], %18 {strides = array<i32>} : memref<16x32xf32, #tpu.memory_space<vmem>>, vector<16x32xf32>,
    return
  }
  func.func @transform_0(%arg0: i32) -> (i32, i32) {
    %c0_i32 = arith.constant 0 : i32
    %c0_i32_0 = arith.constant 0 : i32
    return %arg0, %c0_i32 : i32, i32
  }
  func.func @transform_1(%arg0: i32) -> (i32, i32) {
    %c0_i32 = arith.constant 0 : i32
    %c0_i32_0 = arith.constant 0 : i32
    %c0_i32_1 = arith.constant 0 : i32
    return %c0_i32, %c0_i32_0 : i32, i32
  }
  func.func @transform_2(%arg0: i32) -> (i32, i32) {
    %c0_i32 = arith.constant 0 : i32
    %c0_i32_0 = arith.constant 0 : i32
    %c0_i32_1 = arith.constant 0 : i32
    return %c0_i32, %c0_i32_0 : i32, i32
  }
  func.func @transform_3(%arg0: i32) -> (i32, i32) {
    %c0_i32 = arith.constant 0 : i32
    %c0_i32_0 = arith.constant 0 : i32
    %c0_i32_1 = arith.constant 0 : i32
    return %c0_i32, %c0_i32_0 : i32, i32
  }
  func.func @transform_4(%arg0: i32) -> (i32, i32) {
    %c0_i32 = arith.constant 0 : i32
    %c0_i32_0 = arith.constant 0 : i32
    %c0_i32_1 = arith.constant 0 : i32
    return %c0_i32, %c0_i32_0 : i32, i32
  }
  func.func @transform_5(%arg0: i32) -> (i32, i32) {
    %c0_i32 = arith.constant 0 : i32
    %c0_i32_0 = arith.constant 0 : i32
    return %arg0, %c0_i32 : i32, i32
  }
}

module attributes {stable_mosaic.version = 11 : i64} {
  func.func @_mlp_resident_kernel(%arg0: i32, %arg1: memref<16x32xf32, #tpu.memory_space<vmem>>, %arg2: memref<32x128xf32, #tpu.memory_space<vmem>>, %arg3: memref<1x128xf32, #tpu.memory_space<vmem>>, %arg4: memref<128x32xf32, #tpu.memory_space<vmem>>, %arg5: memref<1x32xf32, #tpu.memory_space<vmem>>, %arg6: memref<16x32xf32, #tpu.memory_space<vmem>>) attributes {dimension_semantics = [#tpu.dimension_semantics<parallel>], iteration_bounds = array<i64: 1>, scalar_prefetch = 0 : i64, scratch_operands = 0 : i64, tpu.core_type = #tpu.core_type<tc>, window_params = [{transform_indices = @transform_0, window_bounds = array<i64: 16, 32>}, {pipeline_mode = #tpu.pipeline_mode<synchronous>, transform_indices = @transform_1, window_bounds = array<i64: 32, 128>}, {pipeline_mode = #tpu.pipeline_mode<synchronous>, transform_indices = @transform_2, window_bounds = array<i64: 1, 128>}, {pipeline_mode = #tpu.pipeline_mode<synchronous>, transform_indices = @transform_3, window_bounds = array<i64: 128, 32>}, {pipeline_mode = #tpu.pipeline_mode<synchronous>, transform_indices = @transform_4, window_bounds = array<i64: 1, 32>}, {transform_indices = @transform_5, window_bounds = array<i64: 16, 32>}]} {
    %c0 = arith.constant 0 : index
    %c0_0 = arith.constant 0 : index
    %0 = vector.load %arg1[%c0, %c0_0] : memref<16x32xf32, #tpu.memory_space<vmem>>, vector<16x32xf32>
    %c0_1 = arith.constant 0 : index
    %c0_2 = arith.constant 0 : index
    %1 = vector.load %arg2[%c0_1, %c0_2] : memref<32x128xf32, #tpu.memory_space<vmem>>, vector<32x128xf32>
    %cst = arith.constant dense<0.000000e+00> : vector<16x128xf32>
    %2 = tpu.matmul %0, %1, %cst {dimension_numbers = #tpu.dot_dimension_numbers<[1], [0], [0], [1], [0, 0, 1, 1], [], []>} : vector<16x32xf32>, vector<32x128xf32>, vector<16x128xf32> -> vector<16x128xf32>
    %c0_3 = arith.constant 0 : index
    %c0_4 = arith.constant 0 : index
    %3 = vector.load %arg3[%c0_3, %c0_4] : memref<1x128xf32, #tpu.memory_space<vmem>>, vector<1x128xf32>
    %4 = vector.broadcast %3 : vector<1x128xf32> to vector<16x128xf32>
    %5 = arith.addf %2, %4 : vector<16x128xf32>
    %cst_5 = arith.constant 5.000000e-01 : f32
    %6 = vector.broadcast %cst_5 : f32 to vector<16x128xf32>
    %7 = arith.mulf %6, %5 : vector<16x128xf32>
    %cst_6 = arith.constant 0.707106769 : f32
    %8 = vector.broadcast %cst_6 : f32 to vector<16x128xf32>
    %9 = arith.mulf %5, %8 : vector<16x128xf32>
    %10 = math.erf %9 : vector<16x128xf32>
    %cst_7 = arith.constant 1.000000e+00 : f32
    %11 = vector.broadcast %cst_7 : f32 to vector<16x128xf32>
    %12 = arith.addf %11, %10 : vector<16x128xf32>
    %13 = arith.mulf %7, %12 : vector<16x128xf32>
    %c0_8 = arith.constant 0 : index
    %c0_9 = arith.constant 0 : index
    %14 = vector.load %arg4[%c0_8, %c0_9] : memref<128x32xf32, #tpu.memory_space<vmem>>, vector<128x32xf32>
    %cst_10 = arith.constant dense<0.000000e+00> : vector<16x32xf32>
    %15 = tpu.matmul %13, %14, %cst_10 {dimension_numbers = #tpu.dot_dimension_numbers<[1], [0], [0], [1], [0, 0, 1, 1], [], []>} : vector<16x128xf32>, vector<128x32xf32>, vector<16x32xf32> -> vector<16x32xf32>
    %c0_11 = arith.constant 0 : index
    %c0_12 = arith.constant 0 : index
    %16 = vector.load %arg5[%c0_11, %c0_12] : memref<1x32xf32, #tpu.memory_space<vmem>>, vector<1x32xf32>
    %17 = vector.broadcast %16 : vector<1x32xf32> to vector<16x32xf32>
    %18 = arith.addf %15, %17 : vector<16x32xf32>
    %c0_13 = arith.constant 0 : index
    %c0_14 = arith.constant 0 : index
    %19 = vector.load %arg6[%c0_13, %c0_14] : memref<16x32xf32, #tpu.memory_space<vmem>>, vector<16x32xf32>
    tpu.vector_store %arg6[%c0_13, %c0_14], %18 {strides = array<i32>} : memref<16x32xf32, #tpu.memory_space<vmem>>, vector<16x32xf32>,
    return
  }
  func.func @transform_0(%arg0: i32) -> (i32, i32) {
    %c0_i32 = arith.constant 0 : i32
    %c0_i32_0 = arith.constant 0 : i32
    return %arg0, %c0_i32 : i32, i32
  }
  func.func @transform_1(%arg0: i32) -> (i32, i32) {
    %c0_i32 = arith.constant 0 : i32
    %c0_i32_0 = arith.constant 0 : i32
    %c0_i32_1 = arith.constant 0 : i32
    return %c0_i32, %c0_i32_0 : i32, i32
  }
  func.func @transform_2(%arg0: i32) -> (i32, i32) {
    %c0_i32 = arith.constant 0 : i32
    %c0_i32_0 = arith.constant 0 : i32
    %c0_i32_1 = arith.constant 0 : i32
    return %c0_i32, %c0_i32_0 : i32, i32
  }
  func.func @transform_3(%arg0: i32) -> (i32, i32) {
    %c0_i32 = arith.constant 0 : i32
    %c0_i32_0 = arith.constant 0 : i32
    %c0_i32_1 = arith.constant 0 : i32
    return %c0_i32, %c0_i32_0 : i32, i32
  }
  func.func @transform_4(%arg0: i32) -> (i32, i32) {
    %c0_i32 = arith.constant 0 : i32
    %c0_i32_0 = arith.constant 0 : i32
    %c0_i32_1 = arith.constant 0 : i32
    return %c0_i32, %c0_i32_0 : i32, i32
  }
  func.func @transform_5(%arg0: i32) -> (i32, i32) {
    %c0_i32 = arith.constant 0 : i32
    %c0_i32_0 = arith.constant 0 : i32
    return %arg0, %c0_i32 : i32, i32
  }
}

</mosaic_0001>

<bundles_post_ra>
// kernel: tpu_custom_call.1
= control target key start
LH: loop header
LB: loop body
LE: loop exit
PB: predicated region body
PF: predicated region fallthrough
CT: control target
= control target key end

     0   :  { %vm34_vm0 = vcmask 261120   ;;  %s508_s0 = inlined_call_operand.vmem [shape: f32[16,32], index: 0, kind: input, shape index: {}]   ;;  %s509_s1 = inlined_call_operand.vmem [shape: f32[32,128], index: 1, kind: input, shape index: {}]   ;;  %s510_s2 = inlined_call_operand.vmem [shape: f32[1,128], index: 2, kind: input, shape index: {}]   ;;  %s511_s3 = inlined_call_operand.vmem [shape: f32[128,32], index: 3, kind: input, shape index: {}]   ;;  %s512_s4 = inlined_call_operand.vmem [shape: f32[1,32], index: 4, kind: input, shape index: {}]   ;;  %s513_s5 = inlined_call_operand.hbm [shape: f32[16,32], index: 5, kind: output, shape index: {}]  }
   0x1   :  { %v23_v0 = vld [vmem:[%s509_s1] sm:$0xff]  ;;  %v24_v1 = vld [vmem:[%s509_s1 + $0x8] sm:$0xff]  ;;  %v25_v2 = vld [vmem:[%s509_s1 + $0x10] sm:$0xff] }
   0x2   :  { %v316_v3 = vpack.c.bf16 %v24_v1, %v23_v0  ;;  %v26_v4 = vld [vmem:[%s509_s1 + $0x18] sm:$0xff]  ;;  %v21_v5 = vld [vmem:[%s508_s0] sm:$0xff]  ;;  %v127_v8 = vld [vmem:[%s511_s3 + $0x8] sm:$0xff] }
   0x3   :  { %v320_v6 = vpack.c.bf16 %v26_v4, %v25_v2  ;;  %278 = vmatprep.mubr.msk.f32.mxu0 %vm34_vm0, %v21_v5  ;;  %v126_v7 = vld [vmem:[%s511_s3] sm:$0xff]  ;;  %v128_v9 = vld [vmem:[%s511_s3 + $0x10] sm:$0xff]  ;;  %v129_v11 = vld [vmem:[%s511_s3 + $0x18] sm:$0xff] }
   0x4   :  { %317 = vmatprep.subr.bf16.mxu0 %v316_v3  ;;  %v324_v10 = vpack.c.bf16 %v127_v8, %v126_v7  ;;  %v328_v12 = vpack.c.bf16 %v129_v11, %v128_v9  ;;  %v130_v13 = vld [vmem:[%s511_s3 + $0x20] sm:$0xff]  ;;  %v131_v14 = vld [vmem:[%s511_s3 + $0x28] sm:$0xff] }
   0x5   :  { %319 = vmatpush3.bf16.msra.mxu0 %v316_v3 }
   0x6   :  { %10 = vsyncpa [#allocation3], 0  ;;  %321 = vmatprep.subr.bf16.mxu0 %v320_v6  ;;  %325 = vmatprep.subr.bf16.mxu1 %v324_v10  ;;  %v332_v15 = vpack.c.bf16 %v131_v14, %v130_v13  ;;  %v22_v16 = vld [vmem:[%s508_s0 + $0x8] sm:$0xff]  ;;  %v132_v17 = vld [vmem:[%s511_s3 + $0x30] sm:$0xff]  ;;  %s387_s11 = smov [#allocation2]  }
   0x7   :  { %327 = vmatpush3.bf16.msra.mxu1 %v324_v10  ;;  %v133_v18 = vld [vmem:[%s511_s3 + $0x38] sm:$0xff]  ;;  %v134_v20 = vld [vmem:[%s511_s3 + $0x40] sm:$0xff]  ;;  %v135_v21 = vld [vmem:[%s511_s3 + $0x48] sm:$0xff]  ;;  %s231_s12 = sshll.u32 %s387_s11, 4  ;;  %s232_s12 = int_to_ptr.vmem [resolvable:$true] %s231_s12 }
   0x8   :  { %329 = vmatprep.subr.bf16.mxu1 %v328_v12  ;;  %v336_v19 = vpack.c.bf16 %v133_v18, %v132_v17  ;;  %v340_v22 = vpack.c.bf16 %v135_v21, %v134_v20  ;;  %v136_v23 = vld [vmem:[%s511_s3 + $0x50] sm:$0xff]  ;;  %v137_v24 = vld [vmem:[%s511_s3 + $0x58] sm:$0xff]  ;;  %v138_v26 = vld [vmem:[%s511_s3 + $0x60] sm:$0xff]  ;;  %s363_s13 = scalar_lea.vmem %s232_s12, 256  ;;  %p368_p1 = scmp.lt.s32.totalorder %s232_s12, %s232_s12 }
   0x9   :  { %323 = vmatpush3.bf16.msra.mxu0 %v320_v6  ;;  %v344_v25 = vpack.c.bf16 %v137_v24, %v136_v23  ;;  %v139_v27 = vld [vmem:[%s511_s3 + $0x68] sm:$0xff]  ;;  %v140_v29 = vld [vmem:[%s511_s3 + $0x70] sm:$0xff]  ;;  %v141_v30 = vld [vmem:[%s511_s3 + $0x78] sm:$0xff]  ;;  %p364_p0 = scmp.ne.s32.totalorder %s232_s12, %s363_s13  ;;  %p369_p2 = scmp.lt.s32.totalorder %s363_s13, %s363_s13 }
   0xa   :  { %v348_v28 = vpack.c.bf16 %v139_v27, %v138_v26  ;;  %v352_v31 = vpack.c.bf16 %v141_v30, %v140_v29  ;;  %v242_v32 = vld [vmem:[%s510_s2] ss:$0 sm:$0xff] }
   0xb   :  { %331 = vmatpush3.bf16.msra.mxu1 %v328_v12  ;;  %v245_v47 = vld [vmem:[%s512_s4] ss:$0 sm:$0xff]  ;;  %p370_p3 = por %p369_p2, %p368_p1 }
   0xc   :  { %279 = vmatmul.mubr.msk.f32.vlgmr.msra.gmra.mrb[0].mxu0 %vm34_vm0, %v22_v16  ;;  %333 = vmatprep.subr.bf16.mxu1 %v332_v15 }
   0xd   :  { %p371_p4 = pnand %p370_p3, %p364_p0 }
   0xf   :  { %335 = vmatpush3.bf16.msra.mxu1 %v332_v15 }
  0x10   :  { %337 = vmatprep.subr.bf16.mxu1 %v336_v19 }
  0x13   :  { %339 = vmatpush3.bf16.msra.mxu1 %v336_v19 }
  0x14   :  { %341 = vmatprep.subr.bf16.mxu1 %v340_v22 }
  0x17   :  { %343 = vmatpush3.bf16.msra.mxu1 %v340_v22 }
  0x18   :  { %345 = vmatprep.subr.bf16.mxu1 %v344_v25 }
  0x1b   :  { %347 = vmatpush3.bf16.msra.mxu1 %v344_v25 }
  0x1c   :  { %349 = vmatprep.subr.bf16.mxu1 %v348_v28 }
  0x1f   :  { %351 = vmatpush3.bf16.msra.mxu1 %v348_v28 }
  0x20   :  { %353 = vmatprep.subr.bf16.mxu1 %v352_v31 }
  0x23   :  { %355 = vmatpush3.bf16.msra.mxu1 %v352_v31 }
  0xdf   :  { %v280_v33 = vpop.f32.mrb[0].mxu0 }
  0xe0   :  { %v113_v34 = vadd.f32 %v280_v33, %v242_v32  ;;  %v107_v35 = vpop.f32.mrb[1].mxu0 }
  0xe1   :  { %v108_v36 = vadd.f32 %v242_v32, %v107_v35 }
  0xe2   :  { %v119_v37 = vmul.f32 0.70710677, %v113_v34  ;;  %v117_v44 = vmul.f32 0.5, %v113_v34 }
  0xe3   :  { %v118_v38 = vmul.f32 0.70710677, %v108_v36  ;;  %v116_v42 = vmul.f32 0.5, %v108_v36 }
  0xe4   :  { %359 = verf.f32 %v119_v37 }
  0xe5   :  { %361 = verf.f32 %v118_v38 }
  0xee   :  { %v360_v39 = vpop.eup %359 }
  0xef   :  { %v362_v40 = vpop.eup %361  ;;  %v123_v41 = vadd.f32 1.0, %v360_v39 }
  0xf0   :  { %v122_v43 = vadd.f32 1.0, %v362_v40 }
  0xf1   :  { %v125_v46 = vmul.f32 %v123_v41, %v117_v44 }
  0xf2   :  { %v124_v45 = vmul.f32 %v122_v43, %v116_v42 }
  0xf4   :  { %313 = vmatprep.mubr.f32.mxu1 %v124_v45 }
  0xf5   :  { %314 = vmatmul.mubr.f32.vlgmr.msra.gmra.mrb[0].mxu1 %v125_v46 }
 0x1c8   :  { %v315_v48 = vpop.f32.mrb[0].mxu1 }
 0x1c9   :  { %v221_v49 = vadd.f32 %v315_v48, %v245_v47  ;;  %v215_v50 = vpop.f32.mrb[1].mxu1 }
 0x1ca   :  { %v216_v51 = vadd.f32 %v245_v47, %v215_v50 }
 0x1cb   :  { %225 = vst.msk [vmem:[#allocation2 + $0x8] sm:$0xff] %vm34_vm0, %v221_v49 }
 0x1cc   :  { %224 = vst.msk [vmem:[#allocation2] sm:$0xff] %vm34_vm0, %v216_v51 }
 0x1cd   :  { %374 = shalt.err (!%p371_p4)
}
 0x1ce   :  { %s375_s15 = scalar_lea.hbm %s513_s5, 256 }
 0x1cf   :  { %p376_p5 = scmp.ne.s32.totalorder %s513_s5, %s375_s15  ;;  %p379_p6 = scmp.lt.u32.totalorder %s375_s15, %s513_s5 }
 0x1d1   :  { %p381_p7 = pnand %p379_p6, %p376_p5 }
 0x1d3   :  { %384 = shalt.err (!%p381_p7)
}
 0x1d4   :  { %s388_s20 = smov 128   ;;  %s389_s21 = smov 8  }
 0x1d5   :  { %237 = dma.vmem_to_hbm [thread:$0]  %s232_s12, 256, %s513_s5, [#allocation3], %s388_s20, %s388_s20, %s389_s21  }
 0x1d6   :  { %385 = dma.done.wait [#allocation3], 256  }
 0x1d7   :  { %386 = vsyncadd [#allocation3], 4294967040 }
 0x1d8   :  { %241 = vsyncpa [#allocation3], 1 }

// kernel: tpu_custom_call.1
= control target key start
LH: loop header
LB: loop body
LE: loop exit
PB: predicated region body
PF: predicated region fallthrough
CT: control target
= control target key end

     0   :  { %vm34_vm0 = vcmask 261120   ;;  %s508_s0 = inlined_call_operand.vmem [shape: f32[16,32], index: 0, kind: input, shape index: {}]   ;;  %s509_s1 = inlined_call_operand.vmem [shape: f32[32,128], index: 1, kind: input, shape index: {}]   ;;  %s510_s2 = inlined_call_operand.vmem [shape: f32[1,128], index: 2, kind: input, shape index: {}]   ;;  %s511_s3 = inlined_call_operand.vmem [shape: f32[128,32], index: 3, kind: input, shape index: {}]   ;;  %s512_s4 = inlined_call_operand.vmem [shape: f32[1,32], index: 4, kind: input, shape index: {}]   ;;  %s513_s5 = inlined_call_operand.hbm [shape: f32[16,32], index: 5, kind: output, shape index: {}]  }
   0x1   :  { %v23_v0 = vld [vmem:[%s509_s1] sm:$0xff]  ;;  %v24_v1 = vld [vmem:[%s509_s1 + $0x8] sm:$0xff]  ;;  %v25_v2 = vld [vmem:[%s509_s1 + $0x10] sm:$0xff] }
   0x2   :  { %v316_v3 = vpack.c.bf16 %v24_v1, %v23_v0  ;;  %v26_v4 = vld [vmem:[%s509_s1 + $0x18] sm:$0xff]  ;;  %v21_v5 = vld [vmem:[%s508_s0] sm:$0xff]  ;;  %v127_v8 = vld [vmem:[%s511_s3 + $0x8] sm:$0xff] }
   0x3   :  { %v320_v6 = vpack.c.bf16 %v26_v4, %v25_v2  ;;  %278 = vmatprep.mubr.msk.f32.mxu0 %vm34_vm0, %v21_v5  ;;  %v126_v7 = vld [vmem:[%s511_s3] sm:$0xff]  ;;  %v128_v9 = vld [vmem:[%s511_s3 + $0x10] sm:$0xff]  ;;  %v129_v11 = vld [vmem:[%s511_s3 + $0x18] sm:$0xff] }
   0x4   :  { %317 = vmatprep.subr.bf16.mxu0 %v316_v3  ;;  %v324_v10 = vpack.c.bf16 %v127_v8, %v126_v7  ;;  %v328_v12 = vpack.c.bf16 %v129_v11, %v128_v9  ;;  %v130_v13 = vld [vmem:[%s511_s3 + $0x20] sm:$0xff]  ;;  %v131_v14 = vld [vmem:[%s511_s3 + $0x28] sm:$0xff] }
   0x5   :  { %319 = vmatpush3.bf16.msra.mxu0 %v316_v3 }
   0x6   :  { %10 = vsyncpa [#allocation3], 0  ;;  %321 = vmatprep.subr.bf16.mxu0 %v320_v6  ;;  %325 = vmatprep.subr.bf16.mxu1 %v324_v10  ;;  %v332_v15 = vpack.c.bf16 %v131_v14, %v130_v13  ;;  %v22_v16 = vld [vmem:[%s508_s0 + $0x8] sm:$0xff]  ;;  %v132_v17 = vld [vmem:[%s511_s3 + $0x30] sm:$0xff]  ;;  %s387_s11 = smov [#allocation2]  }
   0x7   :  { %327 = vmatpush3.bf16.msra.mxu1 %v324_v10  ;;  %v133_v18 = vld [vmem:[%s511_s3 + $0x38] sm:$0xff]  ;;  %v134_v20 = vld [vmem:[%s511_s3 + $0x40] sm:$0xff]  ;;  %v135_v21 = vld [vmem:[%s511_s3 + $0x48] sm:$0xff]  ;;  %s231_s12 = sshll.u32 %s387_s11, 4  ;;  %s232_s12 = int_to_ptr.vmem [resolvable:$true] %s231_s12 }
   0x8   :  { %329 = vmatprep.subr.bf16.mxu1 %v328_v12  ;;  %v336_v19 = vpack.c.bf16 %v133_v18, %v132_v17  ;;  %v340_v22 = vpack.c.bf16 %v135_v21, %v134_v20  ;;  %v136_v23 = vld [vmem:[%s511_s3 + $0x50] sm:$0xff]  ;;  %v137_v24 = vld [vmem:[%s511_s3 + $0x58] sm:$0xff]  ;;  %v138_v26 = vld [vmem:[%s511_s3 + $0x60] sm:$0xff]  ;;  %s363_s13 = scalar_lea.vmem %s232_s12, 256  ;;  %p368_p1 = scmp.lt.s32.totalorder %s232_s12, %s232_s12 }
   0x9   :  { %323 = vmatpush3.bf16.msra.mxu0 %v320_v6  ;;  %v344_v25 = vpack.c.bf16 %v137_v24, %v136_v23  ;;  %v139_v27 = vld [vmem:[%s511_s3 + $0x68] sm:$0xff]  ;;  %v140_v29 = vld [vmem:[%s511_s3 + $0x70] sm:$0xff]  ;;  %v141_v30 = vld [vmem:[%s511_s3 + $0x78] sm:$0xff]  ;;  %p364_p0 = scmp.ne.s32.totalorder %s232_s12, %s363_s13  ;;  %p369_p2 = scmp.lt.s32.totalorder %s363_s13, %s363_s13 }
   0xa   :  { %v348_v28 = vpack.c.bf16 %v139_v27, %v138_v26  ;;  %v352_v31 = vpack.c.bf16 %v141_v30, %v140_v29  ;;  %v242_v32 = vld [vmem:[%s510_s2] ss:$0 sm:$0xff] }
   0xb   :  { %331 = vmatpush3.bf16.msra.mxu1 %v328_v12  ;;  %v245_v47 = vld [vmem:[%s512_s4] ss:$0 sm:$0xff]  ;;  %p370_p3 = por %p369_p2, %p368_p1 }
   0xc   :  { %279 = vmatmul.mubr.msk.f32.vlgmr.msra.gmra.mrb[0].mxu0 %vm34_vm0, %v22_v16  ;;  %333 = vmatprep.subr.bf16.mxu1 %v332_v15 }
   0xd   :  { %p371_p4 = pnand %p370_p3, %p364_p0 }
   0xf   :  { %335 = vmatpush3.bf16.msra.mxu1 %v332_v15 }
  0x10   :  { %337 = vmatprep.subr.bf16.mxu1 %v336_v19 }
  0x13   :  { %339 = vmatpush3.bf16.msra.mxu1 %v336_v19 }
  0x14   :  { %341 = vmatprep.subr.bf16.mxu1 %v340_v22 }
  0x17   :  { %343 = vmatpush3.bf16.msra.mxu1 %v340_v22 }
  0x18   :  { %345 = vmatprep.subr.bf16.mxu1 %v344_v25 }
  0x1b   :  { %347 = vmatpush3.bf16.msra.mxu1 %v344_v25 }
  0x1c   :  { %349 = vmatprep.subr.bf16.mxu1 %v348_v28 }
  0x1f   :  { %351 = vmatpush3.bf16.msra.mxu1 %v348_v28 }
  0x20   :  { %353 = vmatprep.subr.bf16.mxu1 %v352_v31 }
  0x23   :  { %355 = vmatpush3.bf16.msra.mxu1 %v352_v31 }
  0xdf   :  { %v280_v33 = vpop.f32.mrb[0].mxu0 }
  0xe0   :  { %v113_v34 = vadd.f32 %v280_v33, %v242_v32  ;;  %v107_v35 = vpop.f32.mrb[1].mxu0 }
  0xe1   :  { %v108_v36 = vadd.f32 %v242_v32, %v107_v35 }
  0xe2   :  { %v119_v37 = vmul.f32 0.70710677, %v113_v34  ;;  %v117_v44 = vmul.f32 0.5, %v113_v34 }
  0xe3   :  { %v118_v38 = vmul.f32 0.70710677, %v108_v36  ;;  %v116_v42 = vmul.f32 0.5, %v108_v36 }
  0xe4   :  { %359 = verf.f32 %v119_v37 }
  0xe5   :  { %361 = verf.f32 %v118_v38 }
  0xee   :  { %v360_v39 = vpop.eup %359 }
  0xef   :  { %v362_v40 = vpop.eup %361  ;;  %v123_v41 = vadd.f32 1.0, %v360_v39 }
  0xf0   :  { %v122_v43 = vadd.f32 1.0, %v362_v40 }
  0xf1   :  { %v125_v46 = vmul.f32 %v123_v41, %v117_v44 }
  0xf2   :  { %v124_v45 = vmul.f32 %v122_v43, %v116_v42 }
  0xf4   :  { %313 = vmatprep.mubr.f32.mxu1 %v124_v45 }
  0xf5   :  { %314 = vmatmul.mubr.f32.vlgmr.msra.gmra.mrb[0].mxu1 %v125_v46 }
 0x1c8   :  { %v315_v48 = vpop.f32.mrb[0].mxu1 }
 0x1c9   :  { %v221_v49 = vadd.f32 %v315_v48, %v245_v47  ;;  %v215_v50 = vpop.f32.mrb[1].mxu1 }
 0x1ca   :  { %v216_v51 = vadd.f32 %v245_v47, %v215_v50 }
 0x1cb   :  { %225 = vst.msk [vmem:[#allocation2 + $0x8] sm:$0xff] %vm34_vm0, %v221_v49 }
 0x1cc   :  { %224 = vst.msk [vmem:[#allocation2] sm:$0xff] %vm34_vm0, %v216_v51 }
 0x1cd   :  { %374 = shalt.err (!%p371_p4)
}
 0x1ce   :  { %s375_s15 = scalar_lea.hbm %s513_s5, 256 }
 0x1cf   :  { %p376_p5 = scmp.ne.s32.totalorder %s513_s5, %s375_s15  ;;  %p379_p6 = scmp.lt.u32.totalorder %s375_s15, %s513_s5 }
 0x1d1   :  { %p381_p7 = pnand %p379_p6, %p376_p5 }
 0x1d3   :  { %384 = shalt.err (!%p381_p7)
}
 0x1d4   :  { %s388_s20 = smov 128   ;;  %s389_s21 = smov 8  }
 0x1d5   :  { %237 = dma.vmem_to_hbm [thread:$0]  %s232_s12, 256, %s513_s5, [#allocation3], %s388_s20, %s388_s20, %s389_s21  }
 0x1d6   :  { %385 = dma.done.wait [#allocation3], 256  }
 0x1d7   :  { %386 = vsyncadd [#allocation3], 4294967040 }
 0x1d8   :  { %241 = vsyncpa [#allocation3], 1 }

</bundles_post_ra>
